<compile_context>
chip_gen: v5e
topology: v5e:2x2
jax: 0.10.0
libtpu: 0.0.40
codegen_flags: <defaults>
</compile_context>

<pallas_src>
import functools

import jax
import jax.numpy as jnp
from jax.experimental import pallas as pl
from jax.experimental.pallas import tpu as pltpu

F_PAD = 128                      # lane-dense padded feature width between kernels
NEG_BIG = -1e30                  # mask value for non-edges (finite, f32-safe)
VMEM_LIMIT = 32 * 1024 * 1024    # sized well above the tile working set (< ~2 MiB)


def _full_spec(shape):
    n = len(shape)
    return pl.BlockSpec(shape, lambda: (0,) * n)


# ----------------------------------------------------------------------------
# Projection kernel: z = h_pad @ W_pad  (K padded to 128, bf16 MXU, f32 out)
# ----------------------------------------------------------------------------
def project_kernel(h_ref, w_ref, z_ref):
    z_ref[...] = jnp.dot(h_ref[...].astype(jnp.bfloat16),
                         w_ref[...].astype(jnp.bfloat16),
                         preferred_element_type=jnp.float32)


def gatv2_project(h_pad, w_pad, *, tile_n=128):
    n, fin = h_pad.shape
    hd = w_pad.shape[1]
    assert n % tile_n == 0
    return pl.pallas_call(
        project_kernel,
        out_shape=jax.ShapeDtypeStruct((n, hd), jnp.float32),
        grid=(n // tile_n,),
        in_specs=[pl.BlockSpec((tile_n, fin), lambda i: (i, 0)),
                  pl.BlockSpec((fin, hd), lambda i: (0, 0))],
        out_specs=pl.BlockSpec((tile_n, hd), lambda i: (i, 0)),
        compiler_params=pltpu.CompilerParams(
            dimension_semantics=("parallel",),
            vmem_limit_bytes=VMEM_LIMIT),
    )(h_pad, w_pad)


# ----------------------------------------------------------------------------
# GATv2 attention layer: tiled over (dst, src), online edge-softmax,
# batched-head aggregation, residual + ELU, lane-dense padded output.
# ----------------------------------------------------------------------------
def gatv2_attn_kernel(attn_ref, zd_ref, zs_ref, adj_ref, *rest,
                      heads, out_dim, negative_slope, residual):
    if residual:
        hres_ref, out_ref, m_ref, l_ref, acc_ref = rest
    else:
        hres_ref = None
        out_ref, m_ref, l_ref, acc_ref = rest

    j = pl.program_id(1)

    @pl.when(j == 0)
    def _init():
        m_ref[...] = jnp.full(m_ref.shape, NEG_BIG, jnp.float32)
        l_ref[...] = jnp.zeros(l_ref.shape, jnp.float32)
        acc_ref[...] = jnp.zeros(acc_ref.shape, jnp.float32)

    zd = zd_ref[...]                             # [TD, H*D] f32 (dst role)
    zs = zs_ref[...]                             # [TS, H*D] f32 (src role)
    adj = adj_ref[...].astype(jnp.float32)       # [TD, TS]  0/1 mask (bf16 in HBM)

    # --- GATv2 scores: per head, accumulated over D channels as 2-D slabs ----
    # e_h[dst, src] = sum_d attn[h*D+d] * leaky_relu(z[dst, c] + z[src, c])
    zs_t = zs.T                                  # [H*D, TS]  src on the lane axis
    e_heads = []
    for h in range(heads):
        e_h = jnp.zeros(adj.shape, jnp.float32)
        for d in range(out_dim):
            c = h * out_dim + d
            s = zd[:, c:c + 1] + zs_t[c:c + 1, :]          # [TD, TS] broadcast add
            s = jnp.where(s > 0, s, negative_slope * s)    # LeakyReLU
            e_h = e_h + attn_ref[c] * s                    # SMEM scalar * slab
        e_heads.append(e_h)
    e = jnp.stack(e_heads, axis=0)                         # [H, TD, TS]
    e = jnp.where(adj[None] > 0, e, NEG_BIG)

    # --- online (flash-style) edge softmax over incoming edges of each dst ---
    m_prev = m_ref[...]                                    # [H, TD, 1]
    m_new = jnp.maximum(m_prev, jnp.max(e, axis=-1, keepdims=True))
    scale = jnp.exp(m_prev - m_new)                        # 1 rescale per dst row
    p = jnp.exp(e - m_new) * adj[None]                     # [H, TD, TS]
    l_ref[...] = scale * l_ref[...] + jnp.sum(p, axis=-1, keepdims=True)

    # --- batched per-head aggregation on the MXU (bf16 in, f32 accumulate) ---
    zs_heads = jnp.stack(
        [zs[:, h * out_dim:(h + 1) * out_dim] for h in range(heads)], axis=0)
    pv = jax.lax.dot_general(
        p.astype(jnp.bfloat16), zs_heads.astype(jnp.bfloat16),
        dimension_numbers=(((2,), (1,)), ((0,), (0,))),
        preferred_element_type=jnp.float32)                # [H, TD, D]
    acc_ref[...] = scale * acc_ref[...] + pv
    m_ref[...] = m_new

    # --- finalize on the last src tile ----------------------------------------
    @pl.when(j == pl.num_programs(1) - 1)
    def _finalize():
        l_safe = jnp.maximum(l_ref[...], 1e-20)            # guard all-masked rows
        inv_l = pl.reciprocal(l_safe, approx=True)         # EUP reciprocal
        res = acc_ref[...] * inv_l                         # [H, TD, D]
        tile_dst = out_ref.shape[0]
        pad = out_ref.shape[1] - heads * out_dim
        parts = [res[h] for h in range(heads)]             # head-major == .flatten(1)
        if pad > 0:
            parts.append(jnp.zeros((tile_dst, pad), jnp.float32))
        out = jnp.concatenate(parts, axis=1)               # [TD, F_PAD] lane-dense
        if residual:
            out = out + hres_ref[...]                      # Identity res_fc
        out_ref[...] = jnp.where(out > 0, out, jnp.exp(out) - 1.0)   # ELU


def gatv2_layer(z, adj_mask, attn_flat, h_res, *, heads, out_dim, negative_slope,
                residual, tile_dst=128, tile_src=128, out_width=F_PAD):
    n = z.shape[0]
    hd = heads * out_dim
    assert z.shape[1] == hd
    assert n % tile_dst == 0 and n % tile_src == 0
    grid = (n // tile_dst, n // tile_src)

    kernel = functools.partial(
        gatv2_attn_kernel, heads=heads, out_dim=out_dim,
        negative_slope=negative_slope, residual=residual)

    in_specs = [
        pl.BlockSpec(memory_space=pltpu.MemorySpace.SMEM),            # attn  [H*D]
        pl.BlockSpec((tile_dst, hd), lambda i, j: (i, 0)),            # z (dst role)
        pl.BlockSpec((tile_src, hd), lambda i, j: (j, 0)),            # z (src role)
        pl.BlockSpec((tile_dst, tile_src), lambda i, j: (i, j)),      # adjacency tile
    ]
    args = [attn_flat, z, z, adj_mask]
    if residual:
        in_specs.append(pl.BlockSpec((tile_dst, out_width), lambda i, j: (i, 0)))
        args.append(h_res)

    return pl.pallas_call(
        kernel,
        out_shape=jax.ShapeDtypeStruct((n, out_width), jnp.float32),
        grid=grid,
        in_specs=in_specs,
        out_specs=pl.BlockSpec((tile_dst, out_width), lambda i, j: (i, 0)),
        scratch_shapes=[
            pltpu.VMEM((heads, tile_dst, 1), jnp.float32),        # running max m
            pltpu.VMEM((heads, tile_dst, 1), jnp.float32),        # running sum l
            pltpu.VMEM((heads, tile_dst, out_dim), jnp.float32),  # running acc
        ],
        compiler_params=pltpu.CompilerParams(
            dimension_semantics=("parallel", "arbitrary"),
            vmem_limit_bytes=VMEM_LIMIT),
    )(*args)


# ----------------------------------------------------------------------------
# Fused predictor: edge gather (one-hot matmul) + pair multiply + MLP,
# positive and negative pair-graphs processed in one call.
# ----------------------------------------------------------------------------
def predictor_kernel(si_ref, di_ref, h_ref, w1_ref, b1_ref, w2_ref, b2_ref,
                     w3_ref, b3_ref, o_ref):
    e = si_ref.shape[0]
    n = h_ref.shape[0]
    # One-hot matmul gather of src/dst node embeddings (keeps gather + pair
    # multiply + MLP fused in VMEM; no HBM round trip of the [E, F] pair feats).
    # TODO(synk): for large N replace the one-hot matmul with a manual DMA row-gather.
    lanes = jax.lax.broadcasted_iota(jnp.int32, (e, n), 1)
    oh_s = jnp.where(lanes == si_ref[...], 1.0, 0.0).astype(jnp.bfloat16)
    oh_d = jnp.where(lanes == di_ref[...], 1.0, 0.0).astype(jnp.bfloat16)
    hmat = h_ref[...].astype(jnp.bfloat16)
    h_src = jnp.dot(oh_s, hmat, preferred_element_type=jnp.float32)
    h_dst = jnp.dot(oh_d, hmat, preferred_element_type=jnp.float32)
    x = h_src * h_dst                                              # [E, F_PAD]
    h1 = jnp.dot(x.astype(jnp.bfloat16), w1_ref[...].astype(jnp.bfloat16),
                 preferred_element_type=jnp.float32) + b1_ref[...]
    h1 = jnp.maximum(h1, 0.0)
    h2 = jnp.dot(h1.astype(jnp.bfloat16), w2_ref[...].astype(jnp.bfloat16),
                 preferred_element_type=jnp.float32) + b2_ref[...]
    h2 = jnp.maximum(h2, 0.0)
    o_ref[...] = jnp.dot(h2.astype(jnp.bfloat16), w3_ref[...].astype(jnp.bfloat16),
                         preferred_element_type=jnp.float32) + b3_ref[...]


def predictor_fused(src_idx, dst_idx, h_pad, pred_params, *, out_width=F_PAD):
    w1, b1, w2, b2, w3, b3 = pred_params
    f_pad = h_pad.shape[1]
    w1p = jnp.pad(w1, ((0, f_pad - w1.shape[0]), (0, 0)))      # K padded to 128
    w3p = jnp.pad(w3, ((0, 0), (0, out_width - w3.shape[1])))  # lane-dense output
    b3p = jnp.pad(b3, ((0, 0), (0, out_width - b3.shape[1])))
    e = src_idx.shape[0]
    return pl.pallas_call(
        predictor_kernel,
        out_shape=jax.ShapeDtypeStruct((e, out_width), jnp.float32),
        in_specs=[_full_spec(src_idx.shape), _full_spec(dst_idx.shape),
                  _full_spec(h_pad.shape),
                  _full_spec(w1p.shape), _full_spec(b1.shape),
                  _full_spec(w2.shape), _full_spec(b2.shape),
                  _full_spec(w3p.shape), _full_spec(b3p.shape)],
        out_specs=_full_spec((e, out_width)),
        compiler_params=pltpu.CompilerParams(vmem_limit_bytes=VMEM_LIMIT),
    )(src_idx, dst_idx, h_pad, w1p, b1, w2, b2, w3p, b3p)


# ----------------------------------------------------------------------------
# Full GATv2.forward
# ----------------------------------------------------------------------------
def gatv2_forward(x, adj_mask, pos_edges, neg_edges, layer_params, pred_params, *,
                  heads, hid_size, negative_slope, residual,
                  tile_dst=128, tile_src=128, tile_n=128):
    # lane-dense node features: pad feature dim to F_PAD (zeros beyond real cols)
    h = jnp.pad(x, ((0, 0), (0, F_PAD - x.shape[1])))
    adj_bf16 = adj_mask.astype(jnp.bfloat16)    # 0/1 mask; halves HBM traffic

    for l, (w, attn) in enumerate(layer_params):
        w_pad = jnp.pad(w, ((0, F_PAD - w.shape[0]), (0, 0)))   # pad K to 128
        z = gatv2_project(h, w_pad, tile_n=tile_n)              # [N, H*D]
        use_res = residual and l > 0                            # first layer: no residual
        h = gatv2_layer(z, adj_bf16, attn.reshape(-1),
                        h if use_res else None,
                        heads=heads[l], out_dim=hid_size,
                        negative_slope=negative_slope, residual=use_res,
                        tile_dst=tile_dst, tile_src=tile_src)

    # fused predictor: pos and neg pair-graphs in one call
    pos_src, pos_dst = pos_edges
    neg_src, neg_dst = neg_edges
    n_pos, n_neg = pos_src.shape[0], neg_src.shape[0]
    e_total = n_pos + n_neg
    e_pad = ((e_total + 7) // 8) * 8
    src_idx = jnp.zeros((e_pad,), jnp.int32).at[:e_total].set(
        jnp.concatenate([pos_src, neg_src]).astype(jnp.int32))
    dst_idx = jnp.zeros((e_pad,), jnp.int32).at[:e_total].set(
        jnp.concatenate([pos_dst, neg_dst]).astype(jnp.int32))
    scores = predictor_fused(src_idx[:, None], dst_idx[:, None], h, pred_params)
    h_pos = scores[:n_pos, 0:1]
    h_neg = scores[n_pos:e_total, 0:1]
    return h_pos, h_neg


if __name__ == "__main__":
    # Config consistent with the module:
    #   in_size=16, hid_size=8, num_layers=2, heads=[4, 4],
    #   activation=ELU, feat_drop=attn_drop=0, negative_slope=0.2, residual=True.
    N = 256
    in_size = 16
    hid_size = 8
    heads = [4, 4]
    negative_slope = 0.2
    residual = True
    n_pos, n_neg = 10, 10

    key = jax.random.PRNGKey(0)
    ks = jax.random.split(key, 16)

    x = jax.random.normal(ks[0], (N, in_size), dtype=jnp.float32)

    # synthetic dense block adjacency shared by both layers, self-loops included
    # (self-loop invariant guarantees every dst row has >= 1 in-edge).
    adj = (jax.random.uniform(ks[1], (N, N)) < 0.05).astype(jnp.float32)
    adj = jnp.maximum(adj, jnp.eye(N, dtype=jnp.float32))

    def init_layer(k, fin, h, d):
        k1, k2 = jax.random.split(k)
        w = jax.random.normal(k1, (fin, h * d), jnp.float32) * (1.0 / jnp.sqrt(fin))
        attn = jax.random.normal(k2, (h, d), jnp.float32) * (1.0 / jnp.sqrt(d))
        return w, attn

    layer_params = [
        init_layer(ks[2], in_size, heads[0], hid_size),
        init_layer(ks[3], hid_size * heads[0], heads[1], hid_size),
    ]

    # Predictor: Linear(32,8) -> ReLU -> Linear(8,8) -> ReLU -> Linear(8,1)
    f_in = hid_size * heads[-1]
    w1 = jax.random.normal(ks[4], (f_in, hid_size), jnp.float32) * (1.0 / jnp.sqrt(f_in))
    b1 = jax.random.normal(ks[5], (1, hid_size), jnp.float32) * 0.01
    w2 = jax.random.normal(ks[6], (hid_size, hid_size), jnp.float32) * (1.0 / jnp.sqrt(hid_size))
    b2 = jax.random.normal(ks[7], (1, hid_size), jnp.float32) * 0.01
    w3 = jax.random.normal(ks[8], (hid_size, 1), jnp.float32) * (1.0 / jnp.sqrt(hid_size))
    b3 = jax.random.normal(ks[9], (1, 1), jnp.float32) * 0.01
    pred_params = (w1, b1, w2, b2, w3, b3)

    # pos / neg pair-graph edges
    pos_src = jax.random.randint(ks[10], (n_pos,), 0, N)
    pos_dst = jax.random.randint(ks[11], (n_pos,), 0, N)
    neg_src = jax.random.randint(ks[12], (n_neg,), 0, N)
    neg_dst = jax.random.randint(ks[13], (n_neg,), 0, N)

    h_pos, h_neg = gatv2_forward(
        x, adj, (pos_src, pos_dst), (neg_src, neg_dst),
        layer_params, pred_params,
        heads=heads, hid_size=hid_size,
        negative_slope=negative_slope, residual=residual)

    jax.block_until_ready((h_pos, h_neg))
    assert h_pos.shape == (n_pos, 1) and h_neg.shape == (n_neg, 1)
    assert bool(jnp.all(jnp.isfinite(h_pos))) and bool(jnp.all(jnp.isfinite(h_neg)))
    print("KERNEL_OK")
</pallas_src>

<mosaic_0001>
module attributes {stable_mosaic.version = 11 : i64} {
  func.func @project_kernel(%arg0: i32, %arg1: memref<128x128xf32, #tpu.memory_space<vmem>>, %arg2: memref<128x32xf32, #tpu.memory_space<vmem>>, %arg3: memref<128x32xf32, #tpu.memory_space<vmem>>) attributes {dimension_semantics = [#tpu.dimension_semantics<parallel>], iteration_bounds = array<i64: 2>, scalar_prefetch = 0 : i64, scratch_operands = 0 : i64, tpu.core_type = #tpu.core_type<tc>, window_params = [{transform_indices = @transform_0, window_bounds = array<i64: 128, 128>}, {pipeline_mode = #tpu.pipeline_mode<synchronous>, transform_indices = @transform_1, window_bounds = array<i64: 128, 32>}, {transform_indices = @transform_2, window_bounds = array<i64: 128, 32>}]} {
    %c0 = arith.constant 0 : index
    %c0_0 = arith.constant 0 : index
    %0 = vector.load %arg1[%c0, %c0_0] : memref<128x128xf32, #tpu.memory_space<vmem>>, vector<128x128xf32>
    %1 = arith.truncf %0 : vector<128x128xf32> to vector<128x128xbf16>
    %c0_1 = arith.constant 0 : index
    %c0_2 = arith.constant 0 : index
    %2 = vector.load %arg2[%c0_1, %c0_2] : memref<128x32xf32, #tpu.memory_space<vmem>>, vector<128x32xf32>
    %3 = arith.truncf %2 : vector<128x32xf32> to vector<128x32xbf16>
    %cst = arith.constant dense<0.000000e+00> : vector<128x32xf32>
    %4 = tpu.matmul %1, %3, %cst {dimension_numbers = #tpu.dot_dimension_numbers<[1], [0], [0], [1], [0, 0, 1, 1], [], []>} : vector<128x128xbf16>, vector<128x32xbf16>, vector<128x32xf32> -> vector<128x32xf32>
    %c0_3 = arith.constant 0 : index
    %c0_4 = arith.constant 0 : index
    %5 = vector.load %arg3[%c0_3, %c0_4] : memref<128x32xf32, #tpu.memory_space<vmem>>, vector<128x32xf32>
    tpu.vector_store %arg3[%c0_3, %c0_4], %4 {strides = array<i32>} : memref<128x32xf32, #tpu.memory_space<vmem>>, vector<128x32xf32>,
    return
  }
  func.func @transform_0(%arg0: i32) -> (i32, i32) {
    %c0_i32 = arith.constant 0 : i32
    %c0_i32_0 = arith.constant 0 : i32
    return %arg0, %c0_i32 : i32, i32
  }
  func.func @transform_1(%arg0: i32) -> (i32, i32) {
    %c0_i32 = arith.constant 0 : i32
    %c0_i32_0 = arith.constant 0 : i32
    %c0_i32_1 = arith.constant 0 : i32
    return %c0_i32, %c0_i32_0 : i32, i32
  }
  func.func @transform_2(%arg0: i32) -> (i32, i32) {
    %c0_i32 = arith.constant 0 : i32
    %c0_i32_0 = arith.constant 0 : i32
    return %arg0, %c0_i32 : i32, i32
  }
}

</mosaic_0001>

<bundles_post_ra>
// kernel: tpu_custom_call.1
= control target key start
LH: loop header
LB: loop body
LE: loop exit
PB: predicated region body
PF: predicated region fallthrough
CT: control target
= control target key end

     0   :  { %7 = vsyncpa [#allocation3], 0  ;;  %s702_s0 = inlined_call_operand.hbm [shape: f32[256,128], index: 0, kind: input, shape index: {}]   ;;  %s703_s1 = inlined_call_operand.vmem [shape: f32[128,32], index: 1, kind: input, shape index: {}]   ;;  %s704_s2 = inlined_call_operand.vmem [shape: f32[256,32], index: 2, kind: output, shape index: {}]  }
   0x1   :  { %9 = vsyncpa [#allocation3 + $0x1], 0  ;;  %s511_s9 = smov 0   ;;  %s513_s10 = smov 0  }
   0x2   :  { %s515_s11 = smov 0   ;;  %s517_s12 = smov 0  }
   0x3 LB: > { %s349_s13 = sadd.s32 4294967295, %s492_s12   ;;  %s531_s14 = sadd.s32 1, %s492_s12   ;;  %s492_s12 = sphi %s517_s12, %s711_s12   ;;  %s488_s11 = sphi %s515_s11, %s710_s11   ;;  %s484_s10 = sphi %s513_s10, %s709_s10   ;;  %s480_s9 = sphi %s511_s9, %s708_s9  }
   0x4   : > { %s19_s15 = ssub.s32 %s492_s12, %s531_s14  ;;  %s22_s16 = sadd.s32 1, %s488_s11 }
   0x5   : > { %p20_p0 = scmp.eq.s32.totalorder %s19_s15, 0  ;;  %p29_p1 = scmp.ne.s32.totalorder %s488_s11, %s484_s10 }
   0x6   : > { %p30_p2 = scmp.eq.s32.totalorder %s492_s12, 0  ;;  %p35_p3 = scmp.ne.s32.totalorder %s484_s10, %s480_s9 }
   0x7   : > { %s541_s17 = scalar_select %p20_p0, %s488_s11, %s22_s16  }
   0x8   : > { %p543_p4 = por %p30_p2, %p29_p1  ;;  %p36_p5 = scmp.eq.s32.totalorder %s349_s13, 0 }
   0x9   : > { %p393_p6 = scmp.lt.s32.totalorder %s492_s12, 2  ;;  %s109_s20 = sand.u32 1, %s488_s11  }
   0xa   : > { %p550_p7 = por %p36_p5, %p35_p3  ;;  %s353_s21 = sshll.u32 %s109_s20, 7 }
   0xb   : > { %s362_s22 = sshll.u32 %s492_s12, 7  ;;  %s113_s26 = scalar_lea.vmem [#allocation2], %s353_s21 }
   0xc   : > { %s118_s25 = scalar_lea.hbm %s702_s0, %s362_s22  ;;  %s121_s27 = sshll.u32 %s113_s26, 4  ;;  %s122_s27 = int_to_ptr.vmem [resolvable:$true] %s121_s27 }
   0xd   : > { %s119_s28 = sshll.u32 %s118_s25, 4  ;;  %p561_p8 = pnand %p393_p6, %p543_p4  ;;  %s120_s28 = int_to_ptr.hbm [resolvable:$true] %s119_s28 }
   0xe   : > { %p356_p9 = scmp.ge.s32.totalorder %s492_s12, 1  ;;  %s110_s30 = scalar_lea.sflag [#allocation3], %s109_s20 }
   0xf   : > { %s428_s3 = sshra.s32 %s120_s28, 4  ;;  %p432_p11 = pneg %p561_p8  ;;  %s429_s3 = int_to_ptr.hbm [resolvable:$true] %s428_s3 }
  0x10   : > { %s430_s4 = scalar_lea.hbm %s429_s3, 128  ;;  %s435_s7 = scalar_lea.hbm %s702_s0, 256 }
  0x11   : > { %p431_p10 = scmp.ne.s32.totalorder %s429_s3, %s430_s4  ;;  %p436_p0 = scmp.lt.s32.totalorder %s429_s3, %s702_s0 }
  0x12   : > { %p437_p1 = scmp.lt.s32.totalorder %s435_s7, %s430_s4 }
  0x13   : > { %p433_p12 = pnand %p432_p11, %p431_p10 }
  0x14   : > { %p438_p2 = por %p437_p1, %p436_p0 }
  0x15   : > { %p434_p13 = pneg %p433_p12 }
  0x17   : > { %p439_p3 = pnand %p438_p2, %p434_p13 }
  0x19   : > { %442 = shalt.err (!%p439_p3)
}
  0x1a   : > { %s494_s15 = smov 128   ;;  %s495_s16 = smov 8  }
  0x1b   : > { %392 = dma.hbm_to_vmem [thread:$0]  (!%p561_p8), %s120_s28, 2048, %s122_s27, %s110_s30, %s494_s15, %s494_s15, %s495_s16  }
  0x1c   : > { %p129_p4 = scmp.lt.s32.totalorder %s492_s12, 3 }
  0x1e   : > { %p130_p5 = pnand %p356_p9, %p129_p4 }
  0x1f   : > { %s135_s18 = sand.u32 (!%p130_p5), 1, %s484_s10  }
  0x20   : > { %133 = sbr.rel (%p130_p5) target bundleno = 231 (0xe7), region = 28  ;;  %s357_s20 = sshll.u32 (!%p130_p5), %s135_s18, 7 }
  0x21   : > { %s136_s21 = scalar_lea.sflag (!%p130_p5), [#allocation3], %s135_s18  ;;  %s580_s22 = scalar_lea.vmem (!%p130_p5), [#allocation2], %s357_s20 }
  0x25   : > { %475 = dma.done.wait (%p550_p7), %s136_s21, 2048  }
  0x26   : > { %477 = vsyncadd (%p550_p7), %s136_s21, 4294965248  ;;  %v206_v0 = vld [vmem:[%s703_s1 + $0x70] sm:$0xff]  ;;  %v207_v1 = vld [vmem:[%s703_s1 + $0x78] sm:$0xff]  ;;  %s358_s5 = sshll.u32 %s349_s13, 4  ;;  %vm265_vm0 = vcmask 261120  }
  0x27   : > { %v204_v2 = vld [vmem:[%s703_s1 + $0x60] sm:$0xff]  ;;  %v215_v3 = vpack.c.bf16 %v207_v1, %v206_v0  ;;  %v205_v4 = vld [vmem:[%s703_s1 + $0x68] sm:$0xff]  ;;  %v202_v6 = vld [vmem:[%s703_s1 + $0x50] sm:$0xff]  ;;  %p163_p6 = scmp.lt.s32.totalorder %s358_s5, 31 }
  0x28   : > { %v214_v5 = vpack.c.bf16 %v205_v4, %v204_v2  ;;  %v203_v7 = vld [vmem:[%s703_s1 + $0x58] sm:$0xff]  ;;  %v200_v9 = vld [vmem:[%s703_s1 + $0x40] sm:$0xff]  ;;  %v201_v10 = vld [vmem:[%s703_s1 + $0x48] sm:$0xff] }
  0x29   : > { %216 = vmatpush.bf16.msra.mxu0 %v215_v3  ;;  %363 = vmatpush.bf16.msra.mxu1 %v215_v3  ;;  %v213_v8 = vpack.c.bf16 %v203_v7, %v202_v6  ;;  %v212_v11 = vpack.c.bf16 %v201_v10, %v200_v9  ;;  %v198_v12 = vld [vmem:[%s703_s1 + $0x30] sm:$0xff]  ;;  %v199_v13 = vld [vmem:[%s703_s1 + $0x38] sm:$0xff]  ;;  %v196_v15 = vld [vmem:[%s703_s1 + $0x20] sm:$0xff]  ;;  %s713_s5 = smov (!%p163_p6, %s358_s5), 31 }
  0x2a   : > { %364 = vmatpush.bf16.msra.mxu2 %v215_v3  ;;  %365 = vmatpush.bf16.msra.mxu3 %v215_v3  ;;  %v211_v14 = vpack.c.bf16 %v199_v13, %v198_v12  ;;  %v197_v16 = vld [vmem:[%s703_s1 + $0x28] sm:$0xff]  ;;  %v194_v18 = vld [vmem:[%s703_s1 + $0x10] sm:$0xff]  ;;  %v195_v19 = vld [vmem:[%s703_s1 + $0x18] sm:$0xff]  ;;  %s359_s6 = sshll.u32 %s713_s5, 3 }
  0x2b   : > { %v210_v17 = vpack.c.bf16 %v197_v16, %v196_v15  ;;  %v209_v20 = vpack.c.bf16 %v195_v19, %v194_v18  ;;  %v192_v21 = vld [vmem:[%s703_s1] sm:$0xff]  ;;  %v193_v22 = vld [vmem:[%s703_s1 + $0x8] sm:$0xff]  ;;  %v170_v36 = vld [vmem:[%s580_s22 + $0x10] sm:$0xff]  ;;  %s655_s9 = scalar_lea.vmem %s704_s2, %s359_s6 }
  0x2c   : > { %v168_v23 = vld [vmem:[%s580_s22] sm:$0xff]  ;;  %v169_v24 = vld [vmem:[%s580_s22 + $0x8] sm:$0xff]  ;;  %v208_v25 = vpack.c.bf16 %v193_v22, %v192_v21  ;;  %v171_v37 = vld [vmem:[%s580_s22 + $0x18] sm:$0xff] }
  0x2d   : > { %217 = vmatpush.bf16.msra.mxu0 %v214_v5  ;;  %366 = vmatpush.bf16.msra.mxu1 %v214_v5  ;;  %v172_v26 = vld [vmem:[%s580_s22 + $0x20] sm:$0xff]  ;;  %v173_v27 = vld [vmem:[%s580_s22 + $0x28] sm:$0xff]  ;;  %v184_v32 = vpack.c.bf16 %v169_v24, %v168_v23  ;;  %v174_v38 = vld [vmem:[%s580_s22 + $0x30] sm:$0xff]  ;;  %v185_v44 = vpack.c.bf16 %v171_v37, %v170_v36 }
  0x2e   : > { %367 = vmatpush.bf16.msra.mxu2 %v214_v5  ;;  %368 = vmatpush.bf16.msra.mxu3 %v214_v5  ;;  %v176_v28 = vld [vmem:[%s580_s22 + $0x40] sm:$0xff]  ;;  %v177_v29 = vld [vmem:[%s580_s22 + $0x48] sm:$0xff]  ;;  %v186_v33 = vpack.c.bf16 %v173_v27, %v172_v26  ;;  %v175_v39 = vld [vmem:[%s580_s22 + $0x38] sm:$0xff] }
  0x2f   : > { %v180_v30 = vld [vmem:[%s580_s22 + $0x60] sm:$0xff]  ;;  %v181_v31 = vld [vmem:[%s580_s22 + $0x68] sm:$0xff]  ;;  %v188_v34 = vpack.c.bf16 %v177_v29, %v176_v28  ;;  %v178_v40 = vld [vmem:[%s580_s22 + $0x50] sm:$0xff]  ;;  %v187_v45 = vpack.c.bf16 %v175_v39, %v174_v38 }
  0x30   : > { %v190_v35 = vpack.c.bf16 %v181_v31, %v180_v30  ;;  %v179_v41 = vld [vmem:[%s580_s22 + $0x58] sm:$0xff]  ;;  %v182_v42 = vld [vmem:[%s580_s22 + $0x70] sm:$0xff] }
  0x31   : > { %218 = vmatpush.bf16.msra.mxu0 %v213_v8  ;;  %369 = vmatpush.bf16.msra.mxu1 %v213_v8  ;;  %v183_v43 = vld [vmem:[%s580_s22 + $0x78] sm:$0xff]  ;;  %v189_v46 = vpack.c.bf16 %v179_v41, %v178_v40 }
  0x32   : > { %370 = vmatpush.bf16.msra.mxu2 %v213_v8  ;;  %371 = vmatpush.bf16.msra.mxu3 %v213_v8  ;;  %v191_v47 = vpack.c.bf16 %v183_v43, %v182_v42 }
  0x35   : > { %219 = vmatpush.bf16.msra.mxu0 %v212_v11  ;;  %372 = vmatpush.bf16.msra.mxu1 %v212_v11 }
  0x36   : > { %373 = vmatpush.bf16.msra.mxu2 %v212_v11  ;;  %374 = vmatpush.bf16.msra.mxu3 %v212_v11 }
  0x39   : > { %220 = vmatpush.bf16.msra.mxu0 %v211_v14  ;;  %375 = vmatpush.bf16.msra.mxu1 %v211_v14 }
  0x3a   : > { %376 = vmatpush.bf16.msra.mxu2 %v211_v14  ;;  %377 = vmatpush.bf16.msra.mxu3 %v211_v14 }
  0x3d   : > { %221 = vmatpush.bf16.msra.mxu0 %v210_v17  ;;  %378 = vmatpush.bf16.msra.mxu1 %v210_v17 }
  0x3e   : > { %379 = vmatpush.bf16.msra.mxu2 %v210_v17  ;;  %380 = vmatpush.bf16.msra.mxu3 %v210_v17 }
  0x41   : > { %222 = vmatpush.bf16.msra.mxu0 %v209_v20  ;;  %381 = vmatpush.bf16.msra.mxu1 %v209_v20 }
  0x42   : > { %382 = vmatpush.bf16.msra.mxu2 %v209_v20  ;;  %383 = vmatpush.bf16.msra.mxu3 %v209_v20 }
  0x45   : > { %223 = vmatpush.bf16.msra.mxu0 %v208_v25  ;;  %384 = vmatpush.bf16.msra.mxu1 %v208_v25 }
  0x46   : > { %385 = vmatpush.bf16.msra.mxu2 %v208_v25  ;;  %386 = vmatpush.bf16.msra.mxu3 %v208_v25 }
  0x48   : > { %224 = vmatmul.bf16.vlgmr.msra.gmra.mxu0 %v184_v32  ;;  %234 = vmatmul.bf16.vlgmr.msra.gmra.mxu1 %v186_v33 }
  0x49   : > { %244 = vmatmul.bf16.vlgmr.msra.gmra.mxu2 %v188_v34  ;;  %254 = vmatmul.bf16.vlgmr.msra.gmra.mxu3 %v190_v35 }
  0x58   : > { %229 = vmatmul.bf16.gmra.mxu0 %v185_v44  ;;  %239 = vmatmul.bf16.gmra.mxu1 %v187_v45 }
  0x59   : > { %249 = vmatmul.bf16.gmra.mxu2 %v189_v46  ;;  %259 = vmatmul.bf16.gmra.mxu3 %v191_v47 }
  0xc5   : > { %v225_v48 = vpop.f32.mrf.mxu0  ;;  %v235_v49 = vpop.f32.mrf.mxu1 }
  0xc6   : > { %266 = vst.msk [vmem:[%s655_s9] sm:$0xff] %vm265_vm0, %v225_v48 }
  0xc7   : > { %270 = vst.msk [vmem:[%s655_s9 + $0x20] sm:$0xff] %vm265_vm0, %v235_v49 }
  0xcc   : > { %v245_v50 = vpop.f32.mrf.mxu2  ;;  %v255_v51 = vpop.f32.mrf.mxu3 }
  0xcd   : > { %274 = vst.msk [vmem:[%s655_s9 + $0x40] sm:$0xff] %vm265_vm0, %v245_v50  ;;  %v227_v52 = vpop.f32.mrf.mxu0  ;;  %v237_v53 = vpop.f32.mrf.mxu1 }
  0xce   : > { %278 = vst.msk [vmem:[%s655_s9 + $0x60] sm:$0xff] %vm265_vm0, %v255_v51 }
  0xcf   : > { %267 = vst.msk [vmem:[%s655_s9 + $0x8] sm:$0xff] %vm265_vm0, %v227_v52 }
  0xd0   : > { %271 = vst.msk [vmem:[%s655_s9 + $0x28] sm:$0xff] %vm265_vm0, %v237_v53 }
  0xd4   : > { %v247_v54 = vpop.f32.mrf.mxu2  ;;  %v257_v55 = vpop.f32.mrf.mxu3 }
  0xd5   : > { %275 = vst.msk [vmem:[%s655_s9 + $0x48] sm:$0xff] %vm265_vm0, %v247_v54  ;;  %v230_v56 = vpop.f32.mrf.mxu0  ;;  %v240_v57 = vpop.f32.mrf.mxu1 }
  0xd6   : > { %279 = vst.msk [vmem:[%s655_s9 + $0x68] sm:$0xff] %vm265_vm0, %v257_v55 }
  0xd7   : > { %268 = vst.msk [vmem:[%s655_s9 + $0x10] sm:$0xff] %vm265_vm0, %v230_v56 }
  0xd8   : > { %272 = vst.msk [vmem:[%s655_s9 + $0x30] sm:$0xff] %vm265_vm0, %v240_v57 }
  0xdc   : > { %v250_v58 = vpop.f32.mrf.mxu2  ;;  %v260_v59 = vpop.f32.mrf.mxu3 }
  0xdd   : > { %276 = vst.msk [vmem:[%s655_s9 + $0x50] sm:$0xff] %vm265_vm0, %v250_v58  ;;  %v232_v60 = vpop.f32.mrf.mxu0  ;;  %v242_v61 = vpop.f32.mrf.mxu1 }
  0xde   : > { %280 = vst.msk [vmem:[%s655_s9 + $0x70] sm:$0xff] %vm265_vm0, %v260_v59 }
  0xdf   : > { %269 = vst.msk [vmem:[%s655_s9 + $0x18] sm:$0xff] %vm265_vm0, %v232_v60 }
  0xe0   : > { %273 = vst.msk [vmem:[%s655_s9 + $0x38] sm:$0xff] %vm265_vm0, %v242_v61 }
  0xe4   : > { %v252_v62 = vpop.f32.mrf.mxu2  ;;  %v262_v63 = vpop.f32.mrf.mxu3 }
  0xe5   : > { %277 = vst.msk [vmem:[%s655_s9 + $0x58] sm:$0xff] %vm265_vm0, %v252_v62 }
  0xe6   : > { %281 = vst.msk [vmem:[%s655_s9 + $0x78] sm:$0xff] %vm265_vm0, %v262_v63 }
  0xe7 PF: > { %p12_p7 = scmp.ge.s32.totalorder %s531_s14, 4   ;;  %s708_s9 = smov %s484_s10 }
  0xe8   : > { %s709_s10 = smov %s488_s11  ;;  %s710_s11 = smov %s541_s17 }
  0xe9   : > { %s711_s12 = smov %s531_s14  ;;  %14 = sbr.rel (!%p12_p7) target bundleno = 3 (0x3), region = 68 }
  0xee   :  { %304 = vsyncpa [#allocation3], 1 }
  0xef   :  { %306 = vsyncpa [#allocation3 + $0x1], 1 }

</bundles_post_ra>
